<compile_context>
chip_gen: v7x
topology: tpu7x:2x2x1
jax: 0.10.0
libtpu: 0.0.40
codegen_flags: <defaults>
</compile_context>

<pallas_src>
import jax
import jax.numpy as jnp
from jax.experimental import pallas as pl
from jax.experimental.pallas import tpu as pltpu


def _spatial_loss_kernel(contrast_ref,            # scalar prefetch (SMEM), (1,)
                         org_ref, enh_ref,        # (BB, C, H, W) blocks, VMEM
                         ph_ref, pw_ref,          # (Hp, H), (W, Wp) pool mats
                         mh_ref, mw_ref,          # (Hp, Hp), (Wp, Wp) diff ops
                         wmap_ref,                # (Hp, Wp) boundary weights
                         out_ref):                # (1, 128) per-step partial
    c = contrast_ref[0]
    BB, C, H, W = org_ref.shape

    # Resident constants (DMA'd once, constant index_map).
    ph = ph_ref[...]       # (Hp, H):  0.25 inside each 4-row pooling window
    pw = pw_ref[...]       # (W, Wp):  0.25 inside each 4-col pooling window
    mh = mh_ref[...]       # (Hp, Hp): I - subdiag  -> mh @ zp == d_up
    mw = mw_ref[...]       # (Wp, Wp): I - superdiag -> zp @ mw == d_left
    wmap = wmap_ref[...]   # (Hp, Wp): boundary correction weights (+/-1)

    inv_c_count = 1.0 / C

    total = jnp.zeros((), dtype=jnp.float32)
    for img in range(BB):                         # static, BB is small
        # z = mean_c(contrast*org - enh), accumulated per channel so no full
        # (C,H,W) f32 temporaries are materialized (inputs stay native dtype).
        z = (c * org_ref[img, 0].astype(jnp.float32)
             - enh_ref[img, 0].astype(jnp.float32))
        for ch in range(1, C):
            z = z + (c * org_ref[img, ch].astype(jnp.float32)
                     - enh_ref[img, ch].astype(jnp.float32))
        z = z * inv_c_count                                           # (H, W)

        # 4x4 average pool as two MXU matmuls.
        zp = jnp.dot(ph, jnp.dot(z, pw, preferred_element_type=jnp.float32),
                     preferred_element_type=jnp.float32)              # (Hp, Wp)

        # Zero-padded "left" / "up" difference convs as bidiagonal matmuls.
        d_left = jnp.dot(zp, mw, preferred_element_type=jnp.float32)
        d_up = jnp.dot(mh, zp, preferred_element_type=jnp.float32)

        # right/down terms are mirrors of left/up:
        #   sum(dL^2)+sum(dR^2) = 2*sum(dL^2) - sum(zp[:,0]^2) + sum(zp[:,-1]^2)
        # (analogously for up/down); both boundary corrections are folded into
        # the resident +/-1 weight map.
        total = total + (2.0 * jnp.sum(d_left * d_left + d_up * d_up)
                         + jnp.sum(wmap * zp * zp))

    # Lane-dense (1,128) partial-sum block; reduced (whole array) outside.
    out_ref[...] = jnp.full(out_ref.shape, total, dtype=jnp.float32)


def spatial_loss(org, enhance, contrast=8.0):
    """Pallas implementation of SpatialLoss.forward (learn_contrast=False)."""
    assert org.shape == enhance.shape
    B, C, H, W = org.shape
    assert H % 4 == 0 and W % 4 == 0
    Hp, Wp = H // 4, W // 4
    f32 = jnp.float32

    c_arr = jnp.asarray([contrast], dtype=f32)

    # ---- constant operators, built once in the wrapper (resident in VMEM) ----
    r = jnp.arange(Hp, dtype=jnp.int32)[:, None]
    k = jnp.arange(H, dtype=jnp.int32)[None, :]
    ph = jnp.where((k >= 4 * r) & (k < 4 * r + 4), 0.25, 0.0).astype(f32)      # (Hp, H)

    kw = jnp.arange(W, dtype=jnp.int32)[:, None]
    cw = jnp.arange(Wp, dtype=jnp.int32)[None, :]
    pwc = jnp.where((kw >= 4 * cw) & (kw < 4 * cw + 4), 0.25, 0.0).astype(f32)  # (W, Wp)

    ih = jnp.arange(Hp, dtype=jnp.int32)
    mh = (jnp.eye(Hp, dtype=f32)
          - jnp.where(ih[:, None] == ih[None, :] + 1, 1.0, 0.0).astype(f32))    # I - subdiag
    iw = jnp.arange(Wp, dtype=jnp.int32)
    mw = (jnp.eye(Wp, dtype=f32)
          - jnp.where(iw[None, :] == iw[:, None] + 1, 1.0, 0.0).astype(f32))    # I - superdiag

    rr = jnp.arange(Hp, dtype=jnp.int32)[:, None]
    cc = jnp.arange(Wp, dtype=jnp.int32)[None, :]
    wmap = ((cc == Wp - 1).astype(f32) - (cc == 0).astype(f32)
            + (rr == Hp - 1).astype(f32) - (rr == 0).astype(f32))               # (Hp, Wp)

    # ---- tiling / VMEM budgeting (layout-padding aware) ----
    itemsize = jnp.dtype(org.dtype).itemsize
    sub = {4: 8, 2: 16, 1: 32}.get(itemsize, 8)   # sublane pack factor per dtype

    def rup(x, m):
        return -(-x // m) * m

    img_tile_bytes = C * rup(H, sub) * rup(W, 128) * itemsize

    # Batch images per grid step: big DMAs for small images, but keep >= 2
    # grid steps when possible so both v7x TensorCores get work.
    BB = 1
    for cand in range(1, B + 1):
        if B % cand:
            continue
        if cand * img_tile_bytes > (2 << 20):
            continue
        if cand == 1 or (B // cand) >= 2:
            BB = cand
    G = B // BB

    f32_hw = rup(H, 8) * rup(W, 128) * 4
    const_bytes = 4 * 2 * (rup(Hp, 8) * rup(H, 128) + rup(W, 8) * rup(Wp, 128)
                           + rup(Hp, 8) * rup(Hp, 128) + rup(Wp, 8) * rup(Wp, 128)
                           + rup(Hp, 8) * rup(Wp, 128))
    vmem_need = 2 * 2 * BB * img_tile_bytes + 8 * f32_hw + const_bytes + (2 << 20)
    try:
        vmem_cap = int(getattr(pltpu.get_tpu_info(), "vmem_capacity_bytes", 64 << 20))
    except Exception:
        vmem_cap = 64 << 20
    vmem_limit = int(min(max(vmem_need, 32 << 20), vmem_cap - (4 << 20)))

    partial = pl.pallas_call(
        _spatial_loss_kernel,
        out_shape=jax.ShapeDtypeStruct((G, 1, 128), jnp.float32),
        grid_spec=pltpu.PrefetchScalarGridSpec(
            num_scalar_prefetch=1,
            grid=(G,),
            in_specs=[
                pl.BlockSpec((BB, C, H, W), lambda g, c: (g, 0, 0, 0)),
                pl.BlockSpec((BB, C, H, W), lambda g, c: (g, 0, 0, 0)),
                pl.BlockSpec((Hp, H), lambda g, c: (0, 0)),
                pl.BlockSpec((W, Wp), lambda g, c: (0, 0)),
                pl.BlockSpec((Hp, Hp), lambda g, c: (0, 0)),
                pl.BlockSpec((Wp, Wp), lambda g, c: (0, 0)),
                pl.BlockSpec((Hp, Wp), lambda g, c: (0, 0)),
            ],
            out_specs=pl.BlockSpec((None, 1, 128), lambda g, c: (g, 0, 0)),
        ),
        compiler_params=pltpu.CompilerParams(
            dimension_semantics=("parallel",),
            vmem_limit_bytes=vmem_limit),
    )(c_arr, org, enhance, ph, pwc, mh, mw, wmap)

    # Each grid step writes its partial sum replicated across 128 lanes;
    # reduce the whole array (no strided lane-0 slice) and normalize.
    return jnp.sum(partial) / (128.0 * B * Hp * Wp)


def reference_spatial_loss(org, enh, contrast=8.0):
    """Pure-JAX reference mirroring the PyTorch module exactly."""
    k_left = jnp.array([[0, 0, 0], [-1, 1, 0], [0, 0, 0]], jnp.float32).reshape(1, 1, 3, 3)
    k_right = jnp.array([[0, 0, 0], [0, 1, -1], [0, 0, 0]], jnp.float32).reshape(1, 1, 3, 3)
    k_up = jnp.array([[0, -1, 0], [0, 1, 0], [0, 0, 0]], jnp.float32).reshape(1, 1, 3, 3)
    k_down = jnp.array([[0, 0, 0], [0, 1, 0], [0, -1, 0]], jnp.float32).reshape(1, 1, 3, 3)

    om = jnp.mean(org.astype(jnp.float32), axis=1, keepdims=True)
    em = jnp.mean(enh.astype(jnp.float32), axis=1, keepdims=True)

    def pool(x):
        b, _, h, w = x.shape
        return x.reshape(b, 1, h // 4, 4, w // 4, 4).mean(axis=(3, 5))

    op, ep = pool(om), pool(em)

    def conv(x, k):
        return jax.lax.conv_general_dilated(
            x, k, (1, 1), ((1, 1), (1, 1)),
            dimension_numbers=("NCHW", "OIHW", "NCHW"))

    E = sum((conv(op, k) * contrast - conv(ep, k)) ** 2
            for k in (k_left, k_right, k_up, k_down))
    return jnp.mean(E)


if __name__ == "__main__":
    key = jax.random.PRNGKey(0)
    k1, k2, k3, k4 = jax.random.split(key, 4)

    # Primary check (BB = 1, grid of 2 "parallel" steps).
    org = jax.random.uniform(k1, (2, 4, 16, 16), dtype=jnp.float32)
    enhance = jax.random.uniform(k2, (2, 4, 16, 16), dtype=jnp.float32)
    loss = spatial_loss(org, enhance, contrast=8.0)
    jax.block_until_ready(loss)
    ref = reference_spatial_loss(org, enhance, contrast=8.0)
    assert jnp.allclose(loss, ref, rtol=1e-3, atol=1e-3), (float(loss), float(ref))

    # Secondary check exercising the multi-image-per-step (BB > 1) path.
    org2 = jax.random.uniform(k3, (8, 3, 8, 8), dtype=jnp.float32)
    enh2 = jax.random.uniform(k4, (8, 3, 8, 8), dtype=jnp.float32)
    loss2 = spatial_loss(org2, enh2, contrast=8.0)
    jax.block_until_ready(loss2)
    ref2 = reference_spatial_loss(org2, enh2, contrast=8.0)
    assert jnp.allclose(loss2, ref2, rtol=1e-3, atol=1e-3), (float(loss2), float(ref2))

    print("KERNEL_OK")
</pallas_src>

<mosaic_0001>
module attributes {stable_mosaic.version = 11 : i64} {
  func.func @_spatial_loss_kernel(%arg0: i32, %arg1: memref<1xf32, #tpu.memory_space<smem>>, %arg2: memref<1x4x16x16xf32, #tpu.memory_space<vmem>>, %arg3: memref<1x4x16x16xf32, #tpu.memory_space<vmem>>, %arg4: memref<4x16xf32, #tpu.memory_space<vmem>>, %arg5: memref<16x4xf32, #tpu.memory_space<vmem>>, %arg6: memref<4x4xf32, #tpu.memory_space<vmem>>, %arg7: memref<4x4xf32, #tpu.memory_space<vmem>>, %arg8: memref<4x4xf32, #tpu.memory_space<vmem>>, %arg9: memref<1x1x128xf32, #tpu.memory_space<vmem>>) attributes {dimension_semantics = [#tpu.dimension_semantics<parallel>], iteration_bounds = array<i64: 2>, scalar_prefetch = 1 : i64, scratch_operands = 0 : i64, tpu.core_type = #tpu.core_type<tc>, window_params = [{transform_indices = @transform_0, window_bounds = array<i64: 1, 4, 16, 16>}, {transform_indices = @transform_1, window_bounds = array<i64: 1, 4, 16, 16>}, {pipeline_mode = #tpu.pipeline_mode<synchronous>, transform_indices = @transform_2, window_bounds = array<i64: 4, 16>}, {pipeline_mode = #tpu.pipeline_mode<synchronous>, transform_indices = @transform_3, window_bounds = array<i64: 16, 4>}, {pipeline_mode = #tpu.pipeline_mode<synchronous>, transform_indices = @transform_4, window_bounds = array<i64: 4, 4>}, {pipeline_mode = #tpu.pipeline_mode<synchronous>, transform_indices = @transform_5, window_bounds = array<i64: 4, 4>}, {pipeline_mode = #tpu.pipeline_mode<synchronous>, transform_indices = @transform_6, window_bounds = array<i64: 4, 4>}, {transform_indices = @transform_7, window_bounds = array<i64: 1, 1, 128>}]} {
    %c0 = arith.constant 0 : index
    %0 = memref.load %arg1[%c0] : memref<1xf32, #tpu.memory_space<smem>>
    %c0_0 = arith.constant 0 : index
    %c0_1 = arith.constant 0 : index
    %1 = vector.load %arg4[%c0_0, %c0_1] : memref<4x16xf32, #tpu.memory_space<vmem>>, vector<4x16xf32>
    %c0_2 = arith.constant 0 : index
    %c0_3 = arith.constant 0 : index
    %2 = vector.load %arg5[%c0_2, %c0_3] : memref<16x4xf32, #tpu.memory_space<vmem>>, vector<16x4xf32>
    %c0_4 = arith.constant 0 : index
    %c0_5 = arith.constant 0 : index
    %3 = vector.load %arg6[%c0_4, %c0_5] : memref<4x4xf32, #tpu.memory_space<vmem>>, vector<4x4xf32>
    %c0_6 = arith.constant 0 : index
    %c0_7 = arith.constant 0 : index
    %4 = vector.load %arg7[%c0_6, %c0_7] : memref<4x4xf32, #tpu.memory_space<vmem>>, vector<4x4xf32>
    %c0_8 = arith.constant 0 : index
    %c0_9 = arith.constant 0 : index
    %5 = vector.load %arg8[%c0_8, %c0_9] : memref<4x4xf32, #tpu.memory_space<vmem>>, vector<4x4xf32>
    %c0_10 = arith.constant 0 : index
    %c0_11 = arith.constant 0 : index
    %c0_12 = arith.constant 0 : index
    %c0_13 = arith.constant 0 : index
    %6 = vector.load %arg2[%c0_10, %c0_11, %c0_12, %c0_13] : memref<1x4x16x16xf32, #tpu.memory_space<vmem>>, vector<1x1x16x16xf32>
    %7 = vector.shape_cast %6 : vector<1x1x16x16xf32> to vector<16x16xf32>
    %8 = vector.broadcast %0 : f32 to vector<16x16xf32>
    %9 = arith.mulf %8, %7 : vector<16x16xf32>
    %c0_14 = arith.constant 0 : index
    %c0_15 = arith.constant 0 : index
    %c0_16 = arith.constant 0 : index
    %c0_17 = arith.constant 0 : index
    %10 = vector.load %arg3[%c0_14, %c0_15, %c0_16, %c0_17] : memref<1x4x16x16xf32, #tpu.memory_space<vmem>>, vector<1x1x16x16xf32>
    %11 = vector.shape_cast %10 : vector<1x1x16x16xf32> to vector<16x16xf32>
    %12 = arith.subf %9, %11 : vector<16x16xf32>
    %c0_18 = arith.constant 0 : index
    %c1 = arith.constant 1 : index
    %c0_19 = arith.constant 0 : index
    %c0_20 = arith.constant 0 : index
    %13 = vector.load %arg2[%c0_18, %c1, %c0_19, %c0_20] : memref<1x4x16x16xf32, #tpu.memory_space<vmem>>, vector<1x1x16x16xf32>
    %14 = vector.shape_cast %13 : vector<1x1x16x16xf32> to vector<16x16xf32>
    %15 = vector.broadcast %0 : f32 to vector<16x16xf32>
    %16 = arith.mulf %15, %14 : vector<16x16xf32>
    %c0_21 = arith.constant 0 : index
    %c1_22 = arith.constant 1 : index
    %c0_23 = arith.constant 0 : index
    %c0_24 = arith.constant 0 : index
    %17 = vector.load %arg3[%c0_21, %c1_22, %c0_23, %c0_24] : memref<1x4x16x16xf32, #tpu.memory_space<vmem>>, vector<1x1x16x16xf32>
    %18 = vector.shape_cast %17 : vector<1x1x16x16xf32> to vector<16x16xf32>
    %19 = arith.subf %16, %18 : vector<16x16xf32>
    %20 = arith.addf %12, %19 : vector<16x16xf32>
    %c0_25 = arith.constant 0 : index
    %c2 = arith.constant 2 : index
    %c0_26 = arith.constant 0 : index
    %c0_27 = arith.constant 0 : index
    %21 = vector.load %arg2[%c0_25, %c2, %c0_26, %c0_27] : memref<1x4x16x16xf32, #tpu.memory_space<vmem>>, vector<1x1x16x16xf32>
    %22 = vector.shape_cast %21 : vector<1x1x16x16xf32> to vector<16x16xf32>
    %23 = vector.broadcast %0 : f32 to vector<16x16xf32>
    %24 = arith.mulf %23, %22 : vector<16x16xf32>
    %c0_28 = arith.constant 0 : index
    %c2_29 = arith.constant 2 : index
    %c0_30 = arith.constant 0 : index
    %c0_31 = arith.constant 0 : index
    %25 = vector.load %arg3[%c0_28, %c2_29, %c0_30, %c0_31] : memref<1x4x16x16xf32, #tpu.memory_space<vmem>>, vector<1x1x16x16xf32>
    %26 = vector.shape_cast %25 : vector<1x1x16x16xf32> to vector<16x16xf32>
    %27 = arith.subf %24, %26 : vector<16x16xf32>
    %28 = arith.addf %20, %27 : vector<16x16xf32>
    %c0_32 = arith.constant 0 : index
    %c3 = arith.constant 3 : index
    %c0_33 = arith.constant 0 : index
    %c0_34 = arith.constant 0 : index
    %29 = vector.load %arg2[%c0_32, %c3, %c0_33, %c0_34] : memref<1x4x16x16xf32, #tpu.memory_space<vmem>>, vector<1x1x16x16xf32>
    %30 = vector.shape_cast %29 : vector<1x1x16x16xf32> to vector<16x16xf32>
    %31 = vector.broadcast %0 : f32 to vector<16x16xf32>
    %32 = arith.mulf %31, %30 : vector<16x16xf32>
    %c0_35 = arith.constant 0 : index
    %c3_36 = arith.constant 3 : index
    %c0_37 = arith.constant 0 : index
    %c0_38 = arith.constant 0 : index
    %33 = vector.load %arg3[%c0_35, %c3_36, %c0_37, %c0_38] : memref<1x4x16x16xf32, #tpu.memory_space<vmem>>, vector<1x1x16x16xf32>
    %34 = vector.shape_cast %33 : vector<1x1x16x16xf32> to vector<16x16xf32>
    %35 = arith.subf %32, %34 : vector<16x16xf32>
    %36 = arith.addf %28, %35 : vector<16x16xf32>
    %cst = arith.constant 2.500000e-01 : f32
    %37 = vector.broadcast %cst : f32 to vector<16x16xf32>
    %38 = arith.mulf %36, %37 : vector<16x16xf32>
    %cst_39 = arith.constant dense<0.000000e+00> : vector<16x4xf32>
    %39 = tpu.matmul %38, %2, %cst_39 {dimension_numbers = #tpu.dot_dimension_numbers<[1], [0], [0], [1], [0, 0, 1, 1], [], []>} : vector<16x16xf32>, vector<16x4xf32>, vector<16x4xf32> -> vector<16x4xf32>
    %cst_40 = arith.constant dense<0.000000e+00> : vector<4x4xf32>
    %40 = tpu.matmul %1, %39, %cst_40 {dimension_numbers = #tpu.dot_dimension_numbers<[1], [0], [0], [1], [0, 0, 1, 1], [], []>} : vector<4x16xf32>, vector<16x4xf32>, vector<4x4xf32> -> vector<4x4xf32>
    %cst_41 = arith.constant dense<0.000000e+00> : vector<4x4xf32>
    %41 = tpu.matmul %40, %4, %cst_41 {dimension_numbers = #tpu.dot_dimension_numbers<[1], [0], [0], [1], [0, 0, 1, 1], [], []>} : vector<4x4xf32>, vector<4x4xf32>, vector<4x4xf32> -> vector<4x4xf32>
    %cst_42 = arith.constant dense<0.000000e+00> : vector<4x4xf32>
    %42 = tpu.matmul %3, %40, %cst_42 {dimension_numbers = #tpu.dot_dimension_numbers<[1], [0], [0], [1], [0, 0, 1, 1], [], []>} : vector<4x4xf32>, vector<4x4xf32>, vector<4x4xf32> -> vector<4x4xf32>
    %43 = arith.mulf %41, %41 : vector<4x4xf32>
    %44 = arith.mulf %42, %42 : vector<4x4xf32>
    %45 = arith.addf %43, %44 : vector<4x4xf32>
    %46 = vector.shape_cast %45 : vector<4x4xf32> to vector<1x4x4xf32>
    %cst_43 = arith.constant dense<0.000000e+00> : vector<1xf32>
    %47 = vector.multi_reduction <add>, %46, %cst_43 [1, 2] : vector<1x4x4xf32> to vector<1xf32>
    %48 = vector.shape_cast %47 : vector<1xf32> to vector<1x1x1xf32>
    %49 = vector.extract %48[0, 0, 0] : f32 from vector<1x1x1xf32>
    %cst_44 = arith.constant 2.000000e+00 : f32
    %50 = arith.mulf %cst_44, %49 : f32
    %51 = arith.mulf %5, %40 : vector<4x4xf32>
    %52 = arith.mulf %51, %40 : vector<4x4xf32>
    %53 = vector.shape_cast %52 : vector<4x4xf32> to vector<1x4x4xf32>
    %cst_45 = arith.constant dense<0.000000e+00> : vector<1xf32>
    %54 = vector.multi_reduction <add>, %53, %cst_45 [1, 2] : vector<1x4x4xf32> to vector<1xf32>
    %55 = vector.shape_cast %54 : vector<1xf32> to vector<1x1x1xf32>
    %56 = vector.extract %55[0, 0, 0] : f32 from vector<1x1x1xf32>
    %57 = arith.addf %50, %56 : f32
    %cst_46 = arith.constant 0.000000e+00 : f32
    %58 = arith.addf %cst_46, %57 : f32
    %59 = vector.broadcast %58 : f32 to vector<1x128xf32>
    %c0_47 = arith.constant 0 : index
    %c0_48 = arith.constant 0 : index
    %c0_49 = arith.constant 0 : index
    %60 = vector.load %arg9[%c0_47, %c0_48, %c0_49] : memref<1x1x128xf32, #tpu.memory_space<vmem>>, vector<1x1x128xf32>
    %61 = vector.shape_cast %60 : vector<1x1x128xf32> to vector<1x128xf32>
    %62 = vector.shape_cast %59 : vector<1x128xf32> to vector<1x1x128xf32>
    tpu.vector_store %arg9[%c0_47, %c0_48, %c0_49], %62 {strides = array<i32>} : memref<1x1x128xf32, #tpu.memory_space<vmem>>, vector<1x1x128xf32>,
    return
  }
  func.func @transform_0(%arg0: i32, %arg1: memref<1xf32, #tpu.memory_space<smem>>) -> (i32, i32, i32, i32) {
    %c0_i32 = arith.constant 0 : i32
    %c0_i32_0 = arith.constant 0 : i32
    %c0_i32_1 = arith.constant 0 : i32
    %c0_i32_2 = arith.constant 0 : i32
    return %arg0, %c0_i32, %c0_i32_0, %c0_i32_1 : i32, i32, i32, i32
  }
  func.func @transform_1(%arg0: i32, %arg1: memref<1xf32, #tpu.memory_space<smem>>) -> (i32, i32, i32, i32) {
    %c0_i32 = arith.constant 0 : i32
    %c0_i32_0 = arith.constant 0 : i32
    %c0_i32_1 = arith.constant 0 : i32
    %c0_i32_2 = arith.constant 0 : i32
    return %arg0, %c0_i32, %c0_i32_0, %c0_i32_1 : i32, i32, i32, i32
  }
  func.func @transform_2(%arg0: i32, %arg1: memref<1xf32, #tpu.memory_space<smem>>) -> (i32, i32) {
    %c0_i32 = arith.constant 0 : i32
    %c0_i32_0 = arith.constant 0 : i32
    %c0_i32_1 = arith.constant 0 : i32
    return %c0_i32, %c0_i32_0 : i32, i32
  }
  func.func @transform_3(%arg0: i32, %arg1: memref<1xf32, #tpu.memory_space<smem>>) -> (i32, i32) {
    %c0_i32 = arith.constant 0 : i32
    %c0_i32_0 = arith.constant 0 : i32
    %c0_i32_1 = arith.constant 0 : i32
    return %c0_i32, %c0_i32_0 : i32, i32
  }
  func.func @transform_4(%arg0: i32, %arg1: memref<1xf32, #tpu.memory_space<smem>>) -> (i32, i32) {
    %c0_i32 = arith.constant 0 : i32
    %c0_i32_0 = arith.constant 0 : i32
    %c0_i32_1 = arith.constant 0 : i32
    return %c0_i32, %c0_i32_0 : i32, i32
  }
  func.func @transform_5(%arg0: i32, %arg1: memref<1xf32, #tpu.memory_space<smem>>) -> (i32, i32) {
    %c0_i32 = arith.constant 0 : i32
    %c0_i32_0 = arith.constant 0 : i32
    %c0_i32_1 = arith.constant 0 : i32
    return %c0_i32, %c0_i32_0 : i32, i32
  }
  func.func @transform_6(%arg0: i32, %arg1: memref<1xf32, #tpu.memory_space<smem>>) -> (i32, i32) {
    %c0_i32 = arith.constant 0 : i32
    %c0_i32_0 = arith.constant 0 : i32
    %c0_i32_1 = arith.constant 0 : i32
    return %c0_i32, %c0_i32_0 : i32, i32
  }
  func.func @transform_7(%arg0: i32, %arg1: memref<1xf32, #tpu.memory_space<smem>>) -> (i32, i32, i32) {
    %c0_i32 = arith.constant 0 : i32
    %c0_i32_0 = arith.constant 0 : i32
    %c0_i32_1 = arith.constant 0 : i32
    return %arg0, %c0_i32, %c0_i32_0 : i32, i32, i32
  }
}

</mosaic_0001>

<bundles_post_ra>
// kernel: tpu_custom_call.1
= control target key start
LH: loop header
LB: loop body
LE: loop exit
PB: predicated region body
PF: predicated region fallthrough
CT: control target
= control target key end

     0   :  { %s1422_s0 = inlined_call_operand.<no memory space> [shape: f32[1], index: 0, kind: input, shape index: {}]   ;;  %s1423_s1 = inlined_call_operand.hbm [shape: f32[2,4,16,16], index: 1, kind: input, shape index: {}]   ;;  %s1424_s2 = inlined_call_operand.hbm [shape: f32[2,4,16,16], index: 2, kind: input, shape index: {}]   ;;  %s1425_s3 = inlined_call_operand.vmem [shape: f32[4,16], index: 3, kind: input, shape index: {}]   ;;  %s1426_s4 = inlined_call_operand.vmem [shape: f32[16,4], index: 4, kind: input, shape index: {}]   ;;  %s1427_s5 = inlined_call_operand.vmem [shape: f32[4,4], index: 5, kind: input, shape index: {}]   ;;  %s1428_s6 = inlined_call_operand.vmem [shape: f32[4,4], index: 6, kind: input, shape index: {}]   ;;  %s1429_s7 = inlined_call_operand.vmem [shape: f32[4,4], index: 7, kind: input, shape index: {}]   ;;  %s1430_s8 = inlined_call_operand.hbm [shape: f32[2,1,128], index: 8, kind: output, shape index: {}]  }
   0x1   :  { %1435 = sst [smem:[#allocation14_spill]] %s1423_s1 }
   0x2   :  { %13 = sst [smem:[#allocation3]] %s1422_s0 }
   0x3   :  { %14 = vsyncpa [#allocation5], 0 }
   0x4   :  { %16 = vsyncpa [#allocation5 + $0x1], 0 }
   0x5   :  { %17 = vsyncpa [#allocation8], 0 }
   0x6   :  { %19 = vsyncpa [#allocation8 + $0x1], 0 }
   0x7   :  { %20 = vsyncpa [#allocation6], 0 }
   0x8   :  { %22 = vsyncpa [#allocation6 + $0x1], 0  ;;  %s1159_s29 = smov 0   ;;  %s1161_s30 = smov 0  }
   0x9   :  { %s1163_s9 = smov 0   ;;  %s1165_s10 = smov 0  }
   0xa LB: > { %s1180_s0 = sadd.s32 4294967295, %s1101_s10   ;;  %s833_s11 = sadd.s32 4294967294, %s1101_s10   ;;  %s1101_s10 = sphi %s1165_s10, %s1454_s10   ;;  %s1097_s9 = sphi %s1163_s9, %s1453_s9   ;;  %s1093_s30 = sphi %s1161_s30, %s1452_s30   ;;  %s1089_s29 = sphi %s1159_s29, %s1451_s29  }
   0xb   : > { %s1184_s12 = sadd.s32 1, %s1101_s10   ;;  %s35_s13 = sadd.s32 1, %s1097_s9 }
   0xc   : > { %s32_s14 = ssub.s32 %s1101_s10, %s1184_s12  ;;  %p42_p0 = scmp.ne.s32.totalorder %s1097_s9, %s1093_s30 }
   0xd   : > { %p33_p1 = scmp.eq.s32.totalorder %s32_s14, 0  ;;  %p43_p2 = scmp.eq.s32.totalorder %s1101_s10, 0 }
   0xe   : > { %p48_p3 = scmp.ne.s32.totalorder %s1093_s30, %s1089_s29  ;;  %p49_p4 = scmp.eq.s32.totalorder %s1180_s0, 0 }
   0xf   : > { %s1196_s15 = scalar_select %p33_p1, %s1097_s9, %s35_s13  }
  0x10   : > { %p1198_p5 = por %p43_p2, %p42_p0  ;;  %p1202_p6 = por %p49_p4, %p48_p3 }
  0x11   : > { %1436 = sst [smem:[#allocation13_spill]] %s1196_s15  ;;  %p203_p7 = scmp.eq.s32.totalorder %s1180_s0, 1 }
  0x12   : > { %s1438_s17 = scalar_select %p1202_p6, 1, 0 }
  0x13   : > { %p209_p8 = scmp.eq.s32.totalorder %s833_s11, 1  ;;  %p932_p10 = scmp.lt.s32.totalorder %s1101_s10, 2 }
  0x14   : > { %p1209_p11 = por %p203_p7, %p42_p0  ;;  %s1218_s20 = sand.u32 1, %s1097_s9  }
  0x15   : > { %p1213_p12 = por %p209_p8, %p48_p3  ;;  %s867_s21 = sshll.u32 %s1101_s10, 10 }
  0x16   : > { %s1439_s18 = scalar_select %p1209_p11, 1, 0 }
  0x17   : > { %s1440_s19 = scalar_select %p1213_p12, 1, 0 }
  0x18   : > { %s1431_s22 = sshll.u32 %s1218_s20, 6  ;;  %s1441_s1 = sld [smem:[#allocation14_spill]] }
  0x19   : > { %s248_s26 = scalar_lea.vmem [#allocation4], %s1431_s22  ;;  %p1233_p13 = pnand %p932_p10, %p1198_p5 }
  0x1a   : > { %s255_s27 = sshll.u32 %s248_s26, 4  ;;  %s245_s11 = scalar_lea.sflag [#allocation5], %s1218_s20  ;;  %s1237_s27 = int_to_ptr.vmem [resolvable:$true] %s255_s27 }
  0x1b   : > { %p973_p1 = pneg %p1233_p13 }
  0x1e   : > { %s1227_s25 = scalar_lea.hbm %s1441_s1, %s867_s21  ;;  %s976_s16 = scalar_lea.hbm %s1441_s1, 2048 }
  0x1f   : > { %s971_s13 = scalar_lea.hbm %s1227_s25, 1024  ;;  %p977_p4 = scmp.lt.u32.totalorder %s1227_s25, %s1441_s1 }
  0x20   : > { %p972_p0 = scmp.ne.s32.totalorder %s1227_s25, %s971_s13  ;;  %p978_p5 = scmp.lt.u32.totalorder %s976_s16, %s971_s13 }
  0x21   : > { %p980_p8 = scmp.lt.u32.totalorder %s971_s13, %s1227_s25 }
  0x22   : > { %p974_p2 = pnand %p973_p1, %p972_p0  ;;  %p979_p7 = por %p978_p5, %p977_p4 }
  0x24   : > { %p975_p3 = pneg %p974_p2  ;;  %p981_p10 = por %p980_p8, %p979_p7 }
  0x26   : > { %p982_p9 = pnand %p981_p10, %p975_p3 }
  0x28   : > { %985 = shalt.err (!%p982_p9)
}
  0x29   : > { %s986_s22 = scalar_lea.vmem %s1237_s27, 1024  ;;  %s1103_s14 = smov [#allocation4]  }
  0x2a   : > { %p987_p0 = scmp.ne.s32.totalorder %s1237_s27, %s986_s22  ;;  %s991_s23 = sshll.u32 %s1103_s14, 4  ;;  %s992_s23 = int_to_ptr.vmem [resolvable:$false] %s991_s23 }
  0x2b   : > { %s993_s24 = scalar_lea.vmem %s992_s23, 2048  ;;  %p994_p11 = scmp.lt.s32.totalorder %s1237_s27, %s992_s23 }
  0x2c   : > { %p989_p2 = pnand %p987_p0, %p973_p1  ;;  %p995_p4 = scmp.lt.s32.totalorder %s993_s24, %s986_s22 }
  0x2e   : > { %p990_p12 = pneg %p989_p2  ;;  %p996_p5 = por %p995_p4, %p994_p11 }
  0x30   : > { %p997_p7 = pnand %p996_p5, %p990_p12 }
  0x32   : > { %1000 = shalt.err (!%p997_p7)
}
  0x33   : > { %s1433_s13 = smov 128   ;;  %s1105_s16 = smov 8  }
  0x34   : > { %924 = dma.hbm_to_vmem [thread:$0]  (!%p1233_p13), %s1227_s25, 1024, %s1237_s27, %s245_s11, %s1433_s13, %s1433_s13, %s1105_s16  }
  0x35   : > { %p842_p9 = scmp.ge.s32.totalorder %s1101_s10, 1  ;;  %p284_p11 = scmp.lt.s32.totalorder %s1101_s10, 3 }
  0x36   : > { %s1281_s23 = scalar_lea.hbm %s1424_s2, %s867_s21  ;;  %s1444_s24 = sshll.u32 %s1218_s20, 6 }
  0x37   : > { %p1272_p12 = pnand %p842_p9, %p284_p11  ;;  %s269_s1 = scalar_lea.vmem [#allocation7], %s1444_s24 }
  0x38   : > { %s276_s15 = sshll.u32 %s269_s1, 4  ;;  %s266_s25 = scalar_lea.sflag [#allocation8], %s1218_s20  ;;  %s1285_s15 = int_to_ptr.vmem [resolvable:$true] %s276_s15 }
  0x39   : > { %s1001_s27 = scalar_lea.hbm %s1281_s23, 1024  ;;  %s1006_s21 = scalar_lea.hbm %s1424_s2, 2048 }
  0x3a   : > { %p1002_p3 = scmp.ne.s32.totalorder %s1281_s23, %s1001_s27  ;;  %p1007_p0 = scmp.lt.u32.totalorder %s1281_s23, %s1424_s2 }
  0x3b   : > { %p1008_p2 = scmp.lt.u32.totalorder %s1006_s21, %s1001_s27  ;;  %p1010_p5 = scmp.lt.u32.totalorder %s1001_s27, %s1281_s23 }
  0x3c   : > { %p1004_p8 = pnand %p1002_p3, %p973_p1 }
  0x3d   : > { %p1009_p4 = por %p1008_p2, %p1007_p0 }
  0x3e   : > { %p1005_p10 = pneg %p1004_p8 }
  0x3f   : > { %p1011_p7 = por %p1010_p5, %p1009_p4 }
  0x41   : > { %p1012_p9 = pnand %p1011_p7, %p1005_p10 }
  0x43   : > { %1015 = shalt.err (!%p1012_p9)
}
  0x44   : > { %s1016_s1 = scalar_lea.vmem %s1285_s15, 1024  ;;  %s1106_s24 = smov [#allocation7]  }
  0x45   : > { %p1017_p11 = scmp.ne.s32.totalorder %s1285_s15, %s1016_s1  ;;  %s1021_s11 = sshll.u32 %s1106_s24, 4  ;;  %s1022_s11 = int_to_ptr.vmem [resolvable:$false] %s1021_s11 }
  0x46   : > { %s1023_s13 = scalar_lea.vmem %s1022_s11, 2048  ;;  %p1024_p6 = scmp.lt.s32.totalorder %s1285_s15, %s1022_s11 }
  0x47   : > { %p1019_p3 = pnand %p1017_p11, %p973_p1  ;;  %p1025_p0 = scmp.lt.s32.totalorder %s1023_s13, %s1016_s1 }
  0x49   : > { %p1020_p8 = pneg %p1019_p3  ;;  %p1026_p2 = por %p1025_p0, %p1024_p6 }
  0x4b   : > { %p1027_p4 = pnand %p1026_p2, %p1020_p8 }
  0x4d   : > { %1030 = shalt.err (!%p1027_p4)
}
  0x4e   : > { %s1445_s27 = smov 128   ;;  %288 = sbr.rel (%p1272_p12) target bundleno = 981 (0x3d5), region = 48 }
  0x4f   : > { %927 = dma.hbm_to_vmem [thread:$0]  (!%p1233_p13), %s1281_s23, 1024, %s1285_s15, %s266_s25, %s1445_s27, %s1445_s27, %s1105_s16  }
  0x50   : > { %s1319_s26 = sand.u32 (!%p1272_p12), 1, %s1093_s30   ;;  %p1446_p6 = scmp.ne.s32.totalorder (!%p1272_p12), %s1438_s17, 0 }
  0x51   : > { %s843_s21 = sshll.u32 (!%p1272_p12), %s1319_s26, 6  ;;  %s291_s14 = scalar_lea.sflag (!%p1272_p12), [#allocation5], %s1319_s26 }
  0x52   : > { %s1323_s28 = scalar_lea.vmem (!%p1272_p12), [#allocation4], %s843_s21 }
  0x55   : > { %1076 = dma.done.wait (%p1446_p6), %s291_s14, 1024  }
  0x56   : > { %1078 = vsyncadd (%p1446_p6), %s291_s14, 4294966272  ;;  %s300_s15 = scalar_lea.sflag [#allocation8], %s1319_s26  ;;  %s1330_s20 = scalar_lea.vmem [#allocation7], %s843_s21 }
  0x57   : > { %1080 = dma.done.wait (%p1446_p6), %s300_s15, 1024  }
  0x58   : > { %1082 = vsyncadd (%p1446_p6), %s300_s15, 4294966272  ;;  %s338_s16 = sld [smem:[#allocation3]]  ;;  %v340_v0 = vld [vmem:[%s1426_s4] sm:$0xff]  ;;  %v341_v1 = vld [vmem:[%s1426_s4 + $0x8] sm:$0xff]  ;;  %vm392_vm0 = vcmask 130048   ;;  %v1107_v44 = vmov 0.0|0.0  }
  0x59   : > { %v345_v2 = vld [vmem:[%s1323_s28] sm:$0xff]  ;;  %v904_v4 = vpack.c.bf16 %v341_v1, %v340_v0  ;;  %v845_v7 = vld [vmem:[%s1323_s28 + $0x10] sm:$0xff]  ;;  %v346_v17 = vld [vmem:[%s1323_s28 + $0x8] sm:$0xff]  ;;  %908 = vmatprep.subr.bf16.mxu1 %v1107_v44  ;;  %vm1108_vm1 = vmmov 0   ;;  %v1109_v45 = vmov 0.0   ;;  %vm551_vm2 = vcmask 1043456  }
  0x5a   : > { %v350_v6 = vld [vmem:[%s1330_s20] sm:$0xff]  ;;  %v847_v8 = vld [vmem:[%s1330_s20 + $0x10] sm:$0xff]  ;;  %v351_v18 = vld [vmem:[%s1330_s20 + $0x8] sm:$0xff]  ;;  %891 = vmatprep.mubr.msk.f32.mxu1 %vm1108_vm1, %v1109_v45  ;;  %vm547_vm3 = vcmask 31744   ;;  %vm703_vm4 = vcmask 27648   ;;  %s337_s22 = scalar_lea.vmem [#allocation9], %s1319_s26 }
  0x5b   : > { %v849_v10 = vld [vmem:[%s1323_s28 + $0x20] sm:$0xff]  ;;  %v853_v12 = vld [vmem:[%s1323_s28 + $0x30] sm:$0xff]  ;;  %905 = vmatprep.subr.bf16.mxu0 %v904_v4  ;;  %v846_v21 = vld [vmem:[%s1323_s28 + $0x18] sm:$0xff]  ;;  %s744_s23 = sshll.u32 %s337_s22, 4  ;;  %s732_s13 = scalar_lea.sflag [#allocation6], %s1319_s26  ;;  %s1380_s23 = int_to_ptr.vmem [resolvable:$true] %s744_s23 }
  0x5c   : > { %v851_v11 = vld [vmem:[%s1330_s20 + $0x20] sm:$0xff]  ;;  %v855_v16 = vld [vmem:[%s1330_s20 + $0x30] sm:$0xff]  ;;  %907 = vmatpush3.bf16.msra.mxu0 %v904_v4  ;;  %v848_v22 = vld [vmem:[%s1330_s20 + $0x18] sm:$0xff]  ;;  %s1031_s27 = scalar_lea.vmem %s1380_s23, 16  ;;  %p1447_p1 = scmp.ne.s32.totalorder %s1439_s18, 0 }
  0x5d   : > { %v850_v23 = vld [vmem:[%s1323_s28 + $0x28] sm:$0xff]  ;;  %v854_v28 = vld [vmem:[%s1323_s28 + $0x38] sm:$0xff]  ;;  %894 = vmatprep.subr.mxu0 %v1109_v45  ;;  %v339_v49 = vld [vmem:[%s1425_s3] sm:$0xf]  ;;  %p1032_p13 = scmp.ne.s32.totalorder %s1380_s23, %s1031_s27 }
  0x5e   : > { %v347_v3 = vstv %s338_s16  ;;  %v852_v27 = vld [vmem:[%s1330_s20 + $0x28] sm:$0xff]  ;;  %v856_v33 = vld [vmem:[%s1330_s20 + $0x38] sm:$0xff]  ;;  %v343_v50 = vld [vmem:[%s1428_s6] sm:$0xf]  ;;  %s864_s20 = sshll.u32 %s1180_s0, 4  ;;  %s1110_s0 = smov [#allocation9]  }
  0x5f   : > { %v348_v5 = vmul.f32 %v347_v3, %v345_v2  ;;  %v357_v9 = vmul.f32 %v845_v7, %v347_v3  ;;  %v369_v14 = vmul.f32 %v849_v10, %v347_v3  ;;  %v381_v15 = vmul.f32 %v853_v12, %v347_v3  ;;  %v342_v51 = vld [vmem:[%s1427_s5] sm:$0xf]  ;;  %s1378_s11 = scalar_lea.hbm %s1430_s8, %s864_s20  ;;  %p1033_p12 = pnand %p1032_p13, %p1447_p1 }
  0x60   : > { %v349_v20 = vmul.f32 %v347_v3, %v346_v17  ;;  %v358_v25 = vmul.f32 %v846_v21, %v347_v3  ;;  %v370_v26 = vmul.f32 %v850_v23, %v347_v3  ;;  %v382_v32 = vmul.f32 %v854_v28, %v347_v3  ;;  %v344_v54 = vld [vmem:[%s1429_s7] sm:$0xf]  ;;  %s1035_s21 = sshll.u32 %s1110_s0, 4  ;;  %s1036_s21 = int_to_ptr.vmem [resolvable:$false] %s1035_s21 }
  0x61   : > { %v352_v13 = vsub.f32 %v348_v5, %v350_v6  ;;  %v362_v19 = vsub.f32 %v357_v9, %v847_v8  ;;  %v374_v24 = vsub.f32 %v369_v14, %v851_v11  ;;  %v386_v30 = vsub.f32 %v381_v15, %v855_v16  ;;  %p1034_p10 = pneg %p1033_p12  ;;  %s1037_s14 = scalar_lea.vmem %s1036_s21, 32 }
  0x62   : > { %v353_v31 = vsub.f32 %v349_v20, %v351_v18  ;;  %v363_v34 = vsub.f32 %v358_v25, %v848_v22  ;;  %v375_v35 = vsub.f32 %v370_v26, %v852_v27  ;;  %v387_v38 = vsub.f32 %v382_v32, %v856_v33  ;;  %p1038_p5 = scmp.lt.s32.totalorder %s1380_s23, %s1036_s21  ;;  %p1039_p7 = scmp.lt.s32.totalorder %s1037_s14, %s1031_s27 }
  0x63   : > { %v364_v29 = vadd.f32 %v362_v19, %v352_v13 }
  0x64   : > { %v365_v37 = vadd.f32 %v363_v34, %v353_v31  ;;  %p1040_p9 = por %p1039_p7, %p1038_p5 }
  0x65   : > { %v376_v36 = vadd.f32 %v374_v24, %v364_v29 }
  0x66   : > { %v377_v40 = vadd.f32 %v375_v35, %v365_v37  ;;  %p1041_p11 = pnand %p1040_p9, %p1034_p10 }
  0x67   : > { %v388_v39 = vadd.f32 %v386_v30, %v376_v36 }
  0x68   : > { %v389_v42 = vadd.f32 %v387_v38, %v377_v40 }
  0x69   : > { %v390_v41 = vmul.f32 0.25, %v388_v39 }
  0x6a   : > { %v391_v43 = vmul.f32 0.25, %v389_v42 }
  0x6b   : > { %884 = vmatprep.mubr.msk.f32.mxu0 %vm392_vm0, %v390_v41 }
  0x6c   : > { %885 = vmatmul.mubr.msk.f32.vlgmr.msra.gmra.mrb[0].mxu0 %vm392_vm0, %v391_v43 }
  0x6d   : > { %896 = vmatprep.mubr.msk.f32.mxu0 %vm1108_vm1, %v1109_v45  ;;  %895 = vmatpush3.msk.msra.mxu0 %vm551_vm2, %v343_v50 }
 0x13f   : > { %v886_v46 = vpop.f32.mrb[0].mxu0 }
 0x140   : > { %v465_v47 = vpop.f32.mrb[1].mxu0 }
 0x141   : > { %v909_v48 = vpack.c.bf16 %v886_v46, %v465_v47 }
 0x143   : > { %910 = vmatpush3.bf16.msra.mxu1 %v909_v48 }
 0x144   : > { %899 = vmatprep.subr.mxu1 %v1109_v45 }
 0x146   : > { %892 = vmatmul.mubr.msk.f32.vlgmr.msra.gmra.mrb[0].mxu1 %vm392_vm0, %v339_v49 }
 0x147   : > { %901 = vmatprep.mubr.msk.f32.mxu1 %vm1108_vm1, %v1109_v45 }
 0x219   : > { %v543_v52 = vpop.f32.mrb[0].mxu1 }
 0x21a   : > { %v893_v53 = vpop.f32.mrb[1].mxu1  ;;  %897 = vmatmul.mubr.msk.f32.vlgmr.msra.gmra.mrb[2].mxu0 %vm547_vm3, %v543_v52  ;;  %900 = vmatpush3.msk.msra.mxu1 %vm551_vm2, %v543_v52  ;;  %v715_v61 = vmul.f32 %v543_v52, %v344_v54 }
 0x21b   : > { %902 = vmatmul.mubr.msk.f32.vlgmr.msra.gmra.mrb[2].mxu1 %vm547_vm3, %v342_v51 }
 0x21c   : > { %v716_v0 = vmul.f32 %v715_v61, %v543_v52 }
 0x21e   : > { %v717_v1 = vsel %vm703_vm4, %v716_v0, 0.0 }
 0x2ed   : > { %v621_v55 = vpop.f32.mrb[2].mxu0 }
 0x2ee   : > { %v700_v56 = vmul.f32 %v621_v55, %v621_v55  ;;  %v898_v57 = vpop.f32.mrb[3].mxu0  ;;  %v696_v58 = vpop.f32.mrb[2].mxu1 }
 0x2ef   : > { %v701_v59 = vmul.f32 %v696_v58, %v696_v58  ;;  %v903_v60 = vpop.f32.mrb[3].mxu1 }
 0x2f1   : > { %v702_v62 = vadd.f32 %v701_v59, %v700_v56 }
 0x2f3   : > { %v704_v63 = vsel %vm703_vm4, %v702_v62, 0.0 }
 0x2f4   : > { %705 = vadd.xlane.f32.xlu0 %v704_v63 }
 0x2f8   : > { %718 = vadd.xlane.f32.xlu0 %v717_v1 }
 0x381   : > { %v706_v2 = vpop.xlane.xlu0 %705 }
 0x382   : > { %v707_v3 = vrot.slane %v706_v2, 4 }
 0x384   : > { %v708_v4 = vadd.f32 %v707_v3, %v706_v2 }
 0x385   : > { %v719_v5 = vpop.xlane.xlu0 %718 }
 0x386   : > { %v709_v6 = vrot.slane %v708_v4, 2  ;;  %v720_v7 = vrot.slane %v719_v5, 4 }
 0x388   : > { %v721_v8 = vadd.f32 %v720_v7, %v719_v5  ;;  %v710_v9 = vadd.f32 %v709_v6, %v708_v4 }
 0x38a   : > { %v722_v10 = vrot.slane %v721_v8, 2  ;;  %v711_v11 = vrot.slane %v710_v9, 1 }
 0x38c   : > { %v723_v12 = vadd.f32 %v722_v10, %v721_v8  ;;  %v712_v13 = vadd.f32 %v711_v11, %v710_v9 }
 0x38e   : > { %911 = vpush %v712_v13  ;;  %v724_v14 = vrot.slane %v723_v12, 1 }
 0x390   : > { %v725_v15 = vadd.f32 %v724_v14, %v723_v12 }
 0x392   : > { %913 = vpush %v725_v15 }
 0x3bf   : > { %s912_s15 = spop %911 }
 0x3c0   : > { %s714_s16 = smul.f32 2.0, %s912_s15 }
 0x3c3   : > { %s914_s25 = spop %913 }
 0x3c4   : > { %s727_s1 = sadd.f32 %s914_s25, %s714_s16 }
 0x3c6   : > { %v729_v16 = vstv %s727_s1 }
 0x3c7   : > { %730 = vst [vmem:[%s337_s22] sm:$0x1] %v729_v16 }
 0x3c8   : > { %1044 = shalt.err (!%p1041_p11)
}
 0x3c9   : > { %s1045_s26 = scalar_lea.hbm %s1378_s11, 16  ;;  %s1049_s20 = scalar_lea.hbm %s1430_s8, 32 }
 0x3ca   : > { %p1046_p3 = scmp.ne.s32.totalorder %s1378_s11, %s1045_s26  ;;  %p1050_p2 = scmp.lt.u32.totalorder %s1378_s11, %s1430_s8 }
 0x3cb   : > { %p1051_p4 = scmp.lt.u32.totalorder %s1049_s20, %s1045_s26  ;;  %p1053_p13 = scmp.lt.u32.totalorder %s1045_s26, %s1378_s11 }
 0x3cc   : > { %p1047_p8 = pnand %p1046_p3, %p1447_p1 }
 0x3cd   : > { %p1052_p6 = por %p1051_p4, %p1050_p2 }
 0x3ce   : > { %p1048_p0 = pneg %p1047_p8 }
 0x3cf   : > { %p1054_p12 = por %p1053_p13, %p1052_p6 }
 0x3d1   : > { %p1055_p10 = pnand %p1054_p12, %p1048_p0 }
 0x3d3   : > { %1058 = shalt.err (!%p1055_p10)
}
 0x3d4   : > { %919 = dma.vmem_to_hbm [thread:$0]  (%p1447_p1), %s1380_s23, 16, %s1378_s11, %s732_s13  }
 0x3d5 PF: > { %s756_s25 = sand.u32 1, %s1089_s29   ;;  %p1448_p5 = scmp.ne.s32.totalorder %s1440_s19, 0 }
 0x3d6   : > { %p1449_p7 = scmp.ge.s32.totalorder %s1101_s10, 2  ;;  %s757_s1 = scalar_lea.sflag [#allocation6], %s756_s25 }
 0x3d8   : > { %p929_p9 = pnand %p1449_p7, %p1448_p5 }
 0x3da   : > { %1084 = dma.done.wait (!%p929_p9), %s757_s1, 16  }
 0x3db   : > { %1086 = vsyncadd (!%p929_p9), %s757_s1, 4294967280  ;;  %s1450_s17 = sld [smem:[#allocation13_spill]]  ;;  %p25_p11 = scmp.ge.s32.totalorder %s1184_s12, 4  }
 0x3dc   : > { %s1451_s29 = smov %s1093_s30  ;;  %s1452_s30 = smov %s1097_s9 }
 0x3dd   : > { %s1454_s10 = smov %s1184_s12  ;;  %27 = sbr.rel (!%p25_p11) target bundleno = 10 (0xa), region = 112 }
 0x3e1   : > { %s1453_s9 = smov %s1450_s17 }
 0x3e4   :  { %761 = vsyncpa [#allocation5], 1 }
 0x3e5   :  { %763 = vsyncpa [#allocation5 + $0x1], 1 }
 0x3e6   :  { %764 = vsyncpa [#allocation8], 1 }
 0x3e7   :  { %766 = vsyncpa [#allocation8 + $0x1], 1 }
 0x3e8   :  { %767 = vsyncpa [#allocation6], 1 }
 0x3e9   :  { %769 = vsyncpa [#allocation6 + $0x1], 1 }

</bundles_post_ra>
